<compile_context>
chip_gen: v7x
topology: tpu7x:2x2x1
jax: 0.10.0
libtpu: 0.0.40
codegen_flags: <defaults>
</compile_context>

<pallas_src>
import functools

import jax
import jax.numpy as jnp
from jax.experimental import pallas as pl
from jax.experimental.pallas import tpu as pltpu


def _decoder_kernel(x_ref, h0_ref, c0_ref,
                    w_ih_ref, w_hh_ref, b_ref,
                    w_out_ref, b_out_ref,
                    h_out_ref, c_out_ref, scores_ref,
                    *, T, B, H):
    """x_ref: (T*B, D) time-major, batch-padded.  Weights pre-transposed (in, 4H)."""
    # ---- hoisted input projection: one (T*B, D) @ (D, 4H) MXU matmul ---------
    gates_x = (jnp.dot(x_ref[...], w_ih_ref[...],
                       preferred_element_type=jnp.float32)
               + b_ref[...])                                     # (T*B, 4H) f32

    w_hh = w_hh_ref[...]                                         # (H, 4H)
    mm_dtype = w_hh.dtype                                        # f32 or bf16

    h = h0_ref[...]                                              # (B, H) f32
    c = c0_ref[...]                                              # (B, H) f32

    # Serial recurrence, fully unrolled at trace time (T static & small).
    for t in range(T):
        gx = gates_x[t * B:(t + 1) * B, :]                       # static, 8-aligned
        gates = gx + jnp.dot(h.astype(mm_dtype), w_hh,
                             preferred_element_type=jnp.float32)  # (B, 4H)
        # whole-tile EUP launches: one sigmoid + one tanh over the (B, 4H) tile
        sig = jax.nn.sigmoid(gates)
        th = jnp.tanh(gates)
        i_g = sig[:, 0 * H:1 * H]        # PyTorch gate order [i, f, g, o]
        f_g = sig[:, 1 * H:2 * H]
        g_g = th[:, 2 * H:3 * H]
        o_g = sig[:, 3 * H:4 * H]
        c = f_g * c + i_g * g_g
        h = o_g * jnp.tanh(c)

    h_out_ref[...] = h
    c_out_ref[...] = c
    # Fused linear head on lstm_out[:, -1, :] == h.  Output lanes padded to 128
    # in the wrapper -> unmasked lane-dense store.
    scores_ref[...] = (jnp.dot(h.astype(w_out_ref.dtype), w_out_ref[...],
                               preferred_element_type=jnp.float32)
                       + b_out_ref[...])


def decoder_forward(x, hidden_state, params, *, matmul_dtype=jnp.float32):
    """x: (B, T, D); hidden_state: (h0, c0) each (1, B, H).

    Returns ((h_n, c_n), action_object_scores) matching the PyTorch module.
    matmul_dtype=jnp.bfloat16 is the recommended setting on v6e/v7x (MXU runs
    bf16 at full rate); element-wise state math stays float32 on all chips.
    """
    h0, c0 = hidden_state
    B, T, D = x.shape
    H = h0.shape[-1]
    O = params["w_out"].shape[1]          # actionset_size + objectset_size

    B_pad = ((B + 7) // 8) * 8            # sublane width
    O_pad = ((O + 127) // 128) * 128      # lane width (unmasked vst)

    # time-major, batch padded, flattened so the x @ W_ih projection is one matmul
    x_tm = jnp.transpose(x, (1, 0, 2)).astype(jnp.float32)        # (T, B, D)
    x_tm = jnp.pad(x_tm, ((0, 0), (0, B_pad - B), (0, 0)))
    x_flat = x_tm.reshape(T * B_pad, D).astype(matmul_dtype)      # (T*B_pad, D)

    h0_p = jnp.pad(h0.reshape(B, H).astype(jnp.float32), ((0, B_pad - B), (0, 0)))
    c0_p = jnp.pad(c0.reshape(B, H).astype(jnp.float32), ((0, B_pad - B), (0, 0)))

    # NOTE: w_ih/w_hh are stored PyTorch-style (4H, in); pass the transpose.
    w_ih = params["w_ih"].T.astype(matmul_dtype)                  # (D, 4H)
    w_hh = params["w_hh"].T.astype(matmul_dtype)                  # (H, 4H)
    b = (params["b_ih"] + params["b_hh"]).reshape(1, 4 * H).astype(jnp.float32)
    # w_out is kept as (H, O) == nn.Linear.weight.T; pad output lanes to 128.
    w_out = jnp.pad(params["w_out"].astype(matmul_dtype), ((0, 0), (0, O_pad - O)))
    b_out = jnp.pad(params["b_out"].astype(jnp.float32),
                    ((0, O_pad - O),)).reshape(1, O_pad)

    kernel = functools.partial(_decoder_kernel, T=T, B=B_pad, H=H)
    vmem = lambda: pl.BlockSpec(memory_space=pltpu.MemorySpace.VMEM)

    h_n, c_n, scores = pl.pallas_call(
        kernel,
        out_shape=(
            jax.ShapeDtypeStruct((B_pad, H), jnp.float32),        # h_n
            jax.ShapeDtypeStruct((B_pad, H), jnp.float32),        # c_n
            jax.ShapeDtypeStruct((B_pad, O_pad), jnp.float32),    # scores
        ),
        in_specs=[vmem() for _ in range(8)],
        out_specs=(vmem(), vmem(), vmem()),
    )(x_flat, h0_p, c0_p, w_ih, w_hh, b, w_out, b_out)

    final_hidden = (h_n[:B].reshape(1, B, H), c_n[:B].reshape(1, B, H))
    return final_hidden, scores[:B, :O]


def init_params(key, input_dim, hidden_dim, actionset_size, objectset_size):
    """Deterministic parameter init mirroring nn.LSTM / nn.Linear shapes.

    w_out is stored as (hidden_dim, out_dim) == nn.Linear.weight.T; transpose
    when loading real PyTorch weights.
    """
    k = jax.random.split(key, 6)
    s = 1.0 / jnp.sqrt(hidden_dim)
    out_dim = actionset_size + objectset_size
    return {
        "w_ih": jax.random.uniform(k[0], (4 * hidden_dim, input_dim), jnp.float32, -s, s),
        "w_hh": jax.random.uniform(k[1], (4 * hidden_dim, hidden_dim), jnp.float32, -s, s),
        "b_ih": jax.random.uniform(k[2], (4 * hidden_dim,), jnp.float32, -s, s),
        "b_hh": jax.random.uniform(k[3], (4 * hidden_dim,), jnp.float32, -s, s),
        "w_out": jax.random.uniform(k[4], (hidden_dim, out_dim), jnp.float32, -s, s),
        "b_out": jax.random.uniform(k[5], (out_dim,), jnp.float32, -s, s),
    }


def _reference_forward(x, hidden_state, params):
    """Pure-JAX reference of the PyTorch forward (for correctness check)."""
    h0, c0 = hidden_state
    B, T, D = x.shape
    H = h0.shape[-1]
    h = h0.reshape(B, H)
    c = c0.reshape(B, H)
    w_ih_t = params["w_ih"].T
    w_hh_t = params["w_hh"].T
    b = params["b_ih"] + params["b_hh"]
    for t in range(T):
        gates = x[:, t, :] @ w_ih_t + h @ w_hh_t + b
        i, f, g, o = jnp.split(gates, 4, axis=-1)
        c = jax.nn.sigmoid(f) * c + jax.nn.sigmoid(i) * jnp.tanh(g)
        h = jax.nn.sigmoid(o) * jnp.tanh(c)
    scores = h @ params["w_out"] + params["b_out"]
    return (h.reshape(1, B, H), c.reshape(1, B, H)), scores


if __name__ == "__main__":
    B, T = 2, 8
    INPUT_DIM, HIDDEN_DIM = 16, 32
    ACTIONSET_SIZE, OBJECTSET_SIZE = 8, 8

    key = jax.random.PRNGKey(0)
    kx, kh, kc, kp = jax.random.split(key, 4)

    x = jax.random.normal(kx, (B, T, INPUT_DIM), jnp.float32)
    h0 = jax.random.normal(kh, (1, B, HIDDEN_DIM), jnp.float32)
    c0 = jax.random.normal(kc, (1, B, HIDDEN_DIM), jnp.float32)
    params = init_params(kp, INPUT_DIM, HIDDEN_DIM, ACTIONSET_SIZE, OBJECTSET_SIZE)

    # f32 path (matches the PyTorch/pure-JAX reference tightly)
    (h_n, c_n), scores = decoder_forward(x, (h0, c0), params)
    jax.block_until_ready((h_n, c_n, scores))

    (h_ref, c_ref), s_ref = _reference_forward(x, (h0, c0), params)
    assert h_n.shape == (1, B, HIDDEN_DIM)
    assert c_n.shape == (1, B, HIDDEN_DIM)
    assert scores.shape == (B, ACTIONSET_SIZE + OBJECTSET_SIZE)
    assert jnp.allclose(h_n, h_ref, atol=1e-5)
    assert jnp.allclose(c_n, c_ref, atol=1e-5)
    assert jnp.allclose(scores, s_ref, atol=1e-5)

    # bf16-matmul path (v6e/v7x perf setting) — loose tolerance vs. f32 reference
    (h_bf, c_bf), s_bf = decoder_forward(x, (h0, c0), params,
                                         matmul_dtype=jnp.bfloat16)
    jax.block_until_ready(s_bf)
    assert s_bf.shape == scores.shape and bool(jnp.all(jnp.isfinite(s_bf)))
    assert jnp.allclose(h_bf, h_ref, atol=1.5e-1, rtol=1.5e-1)
    assert jnp.allclose(s_bf, s_ref, atol=1.5e-1, rtol=1.5e-1)

    print("KERNEL_OK")
</pallas_src>

<mosaic_0001>
module attributes {stable_mosaic.version = 11 : i64} {
  func.func @_decoder_kernel(%arg0: memref<64x16xf32, #tpu.memory_space<vmem>>, %arg1: memref<8x32xf32, #tpu.memory_space<vmem>>, %arg2: memref<8x32xf32, #tpu.memory_space<vmem>>, %arg3: memref<16x128xf32, #tpu.memory_space<vmem>>, %arg4: memref<32x128xf32, #tpu.memory_space<vmem>>, %arg5: memref<1x128xf32, #tpu.memory_space<vmem>>, %arg6: memref<32x128xf32, #tpu.memory_space<vmem>>, %arg7: memref<1x128xf32, #tpu.memory_space<vmem>>, %arg8: memref<8x32xf32, #tpu.memory_space<vmem>>, %arg9: memref<8x32xf32, #tpu.memory_space<vmem>>, %arg10: memref<8x128xf32, #tpu.memory_space<vmem>>) attributes {dimension_semantics = [], scalar_prefetch = 0 : i64, scratch_operands = 0 : i64, tpu.core_type = #tpu.core_type<tc>} {
    %c0 = arith.constant 0 : index
    %c0_0 = arith.constant 0 : index
    %0 = vector.load %arg0[%c0, %c0_0] : memref<64x16xf32, #tpu.memory_space<vmem>>, vector<64x16xf32>
    %c0_1 = arith.constant 0 : index
    %c0_2 = arith.constant 0 : index
    %1 = vector.load %arg3[%c0_1, %c0_2] : memref<16x128xf32, #tpu.memory_space<vmem>>, vector<16x128xf32>
    %cst = arith.constant dense<0.000000e+00> : vector<64x128xf32>
    %2 = tpu.matmul %0, %1, %cst {dimension_numbers = #tpu.dot_dimension_numbers<[1], [0], [0], [1], [0, 0, 1, 1], [], []>} : vector<64x16xf32>, vector<16x128xf32>, vector<64x128xf32> -> vector<64x128xf32>
    %c0_3 = arith.constant 0 : index
    %c0_4 = arith.constant 0 : index
    %3 = vector.load %arg5[%c0_3, %c0_4] : memref<1x128xf32, #tpu.memory_space<vmem>>, vector<1x128xf32>
    %4 = vector.broadcast %3 : vector<1x128xf32> to vector<64x128xf32>
    %5 = arith.addf %2, %4 : vector<64x128xf32>
    %c0_5 = arith.constant 0 : index
    %c0_6 = arith.constant 0 : index
    %6 = vector.load %arg4[%c0_5, %c0_6] : memref<32x128xf32, #tpu.memory_space<vmem>>, vector<32x128xf32>
    %c0_7 = arith.constant 0 : index
    %c0_8 = arith.constant 0 : index
    %7 = vector.load %arg1[%c0_7, %c0_8] : memref<8x32xf32, #tpu.memory_space<vmem>>, vector<8x32xf32>
    %c0_9 = arith.constant 0 : index
    %c0_10 = arith.constant 0 : index
    %8 = vector.load %arg2[%c0_9, %c0_10] : memref<8x32xf32, #tpu.memory_space<vmem>>, vector<8x32xf32>
    %9 = vector.extract_strided_slice %5 {offsets = [0, 0], sizes = [8, 128], strides = [1, 1]} : vector<64x128xf32> to vector<8x128xf32>
    %cst_11 = arith.constant dense<0.000000e+00> : vector<8x128xf32>
    %10 = tpu.matmul %7, %6, %cst_11 {dimension_numbers = #tpu.dot_dimension_numbers<[1], [0], [0], [1], [0, 0, 1, 1], [], []>} : vector<8x32xf32>, vector<32x128xf32>, vector<8x128xf32> -> vector<8x128xf32>
    %11 = arith.addf %9, %10 : vector<8x128xf32>
    %12 = arith.negf %11 : vector<8x128xf32>
    %13 = math.exp %12 : vector<8x128xf32>
    %cst_12 = arith.constant 1.000000e+00 : f32
    %14 = vector.broadcast %cst_12 : f32 to vector<8x128xf32>
    %15 = arith.addf %14, %13 : vector<8x128xf32>
    %16 = arith.divf %14, %15 : vector<8x128xf32>
    %17 = math.tanh %11 : vector<8x128xf32>
    %18 = vector.extract_strided_slice %16 {offsets = [0, 0], sizes = [8, 32], strides = [1, 1]} : vector<8x128xf32> to vector<8x32xf32>
    %19 = vector.extract_strided_slice %16 {offsets = [0, 32], sizes = [8, 32], strides = [1, 1]} : vector<8x128xf32> to vector<8x32xf32>
    %20 = vector.extract_strided_slice %17 {offsets = [0, 64], sizes = [8, 32], strides = [1, 1]} : vector<8x128xf32> to vector<8x32xf32>
    %21 = vector.extract_strided_slice %16 {offsets = [0, 96], sizes = [8, 32], strides = [1, 1]} : vector<8x128xf32> to vector<8x32xf32>
    %22 = arith.mulf %19, %8 : vector<8x32xf32>
    %23 = arith.mulf %18, %20 : vector<8x32xf32>
    %24 = arith.addf %22, %23 : vector<8x32xf32>
    %25 = math.tanh %24 : vector<8x32xf32>
    %26 = arith.mulf %21, %25 : vector<8x32xf32>
    %27 = vector.extract_strided_slice %5 {offsets = [8, 0], sizes = [8, 128], strides = [1, 1]} : vector<64x128xf32> to vector<8x128xf32>
    %cst_13 = arith.constant dense<0.000000e+00> : vector<8x128xf32>
    %28 = tpu.matmul %26, %6, %cst_13 {dimension_numbers = #tpu.dot_dimension_numbers<[1], [0], [0], [1], [0, 0, 1, 1], [], []>} : vector<8x32xf32>, vector<32x128xf32>, vector<8x128xf32> -> vector<8x128xf32>
    %29 = arith.addf %27, %28 : vector<8x128xf32>
    %30 = arith.negf %29 : vector<8x128xf32>
    %31 = math.exp %30 : vector<8x128xf32>
    %cst_14 = arith.constant 1.000000e+00 : f32
    %32 = vector.broadcast %cst_14 : f32 to vector<8x128xf32>
    %33 = arith.addf %32, %31 : vector<8x128xf32>
    %34 = arith.divf %32, %33 : vector<8x128xf32>
    %35 = math.tanh %29 : vector<8x128xf32>
    %36 = vector.extract_strided_slice %34 {offsets = [0, 0], sizes = [8, 32], strides = [1, 1]} : vector<8x128xf32> to vector<8x32xf32>
    %37 = vector.extract_strided_slice %34 {offsets = [0, 32], sizes = [8, 32], strides = [1, 1]} : vector<8x128xf32> to vector<8x32xf32>
    %38 = vector.extract_strided_slice %35 {offsets = [0, 64], sizes = [8, 32], strides = [1, 1]} : vector<8x128xf32> to vector<8x32xf32>
    %39 = vector.extract_strided_slice %34 {offsets = [0, 96], sizes = [8, 32], strides = [1, 1]} : vector<8x128xf32> to vector<8x32xf32>
    %40 = arith.mulf %37, %24 : vector<8x32xf32>
    %41 = arith.mulf %36, %38 : vector<8x32xf32>
    %42 = arith.addf %40, %41 : vector<8x32xf32>
    %43 = math.tanh %42 : vector<8x32xf32>
    %44 = arith.mulf %39, %43 : vector<8x32xf32>
    %45 = vector.extract_strided_slice %5 {offsets = [16, 0], sizes = [8, 128], strides = [1, 1]} : vector<64x128xf32> to vector<8x128xf32>
    %cst_15 = arith.constant dense<0.000000e+00> : vector<8x128xf32>
    %46 = tpu.matmul %44, %6, %cst_15 {dimension_numbers = #tpu.dot_dimension_numbers<[1], [0], [0], [1], [0, 0, 1, 1], [], []>} : vector<8x32xf32>, vector<32x128xf32>, vector<8x128xf32> -> vector<8x128xf32>
    %47 = arith.addf %45, %46 : vector<8x128xf32>
    %48 = arith.negf %47 : vector<8x128xf32>
    %49 = math.exp %48 : vector<8x128xf32>
    %cst_16 = arith.constant 1.000000e+00 : f32
    %50 = vector.broadcast %cst_16 : f32 to vector<8x128xf32>
    %51 = arith.addf %50, %49 : vector<8x128xf32>
    %52 = arith.divf %50, %51 : vector<8x128xf32>
    %53 = math.tanh %47 : vector<8x128xf32>
    %54 = vector.extract_strided_slice %52 {offsets = [0, 0], sizes = [8, 32], strides = [1, 1]} : vector<8x128xf32> to vector<8x32xf32>
    %55 = vector.extract_strided_slice %52 {offsets = [0, 32], sizes = [8, 32], strides = [1, 1]} : vector<8x128xf32> to vector<8x32xf32>
    %56 = vector.extract_strided_slice %53 {offsets = [0, 64], sizes = [8, 32], strides = [1, 1]} : vector<8x128xf32> to vector<8x32xf32>
    %57 = vector.extract_strided_slice %52 {offsets = [0, 96], sizes = [8, 32], strides = [1, 1]} : vector<8x128xf32> to vector<8x32xf32>
    %58 = arith.mulf %55, %42 : vector<8x32xf32>
    %59 = arith.mulf %54, %56 : vector<8x32xf32>
    %60 = arith.addf %58, %59 : vector<8x32xf32>
    %61 = math.tanh %60 : vector<8x32xf32>
    %62 = arith.mulf %57, %61 : vector<8x32xf32>
    %63 = vector.extract_strided_slice %5 {offsets = [24, 0], sizes = [8, 128], strides = [1, 1]} : vector<64x128xf32> to vector<8x128xf32>
    %cst_17 = arith.constant dense<0.000000e+00> : vector<8x128xf32>
    %64 = tpu.matmul %62, %6, %cst_17 {dimension_numbers = #tpu.dot_dimension_numbers<[1], [0], [0], [1], [0, 0, 1, 1], [], []>} : vector<8x32xf32>, vector<32x128xf32>, vector<8x128xf32> -> vector<8x128xf32>
    %65 = arith.addf %63, %64 : vector<8x128xf32>
    %66 = arith.negf %65 : vector<8x128xf32>
    %67 = math.exp %66 : vector<8x128xf32>
    %cst_18 = arith.constant 1.000000e+00 : f32
    %68 = vector.broadcast %cst_18 : f32 to vector<8x128xf32>
    %69 = arith.addf %68, %67 : vector<8x128xf32>
    %70 = arith.divf %68, %69 : vector<8x128xf32>
    %71 = math.tanh %65 : vector<8x128xf32>
    %72 = vector.extract_strided_slice %70 {offsets = [0, 0], sizes = [8, 32], strides = [1, 1]} : vector<8x128xf32> to vector<8x32xf32>
    %73 = vector.extract_strided_slice %70 {offsets = [0, 32], sizes = [8, 32], strides = [1, 1]} : vector<8x128xf32> to vector<8x32xf32>
    %74 = vector.extract_strided_slice %71 {offsets = [0, 64], sizes = [8, 32], strides = [1, 1]} : vector<8x128xf32> to vector<8x32xf32>
    %75 = vector.extract_strided_slice %70 {offsets = [0, 96], sizes = [8, 32], strides = [1, 1]} : vector<8x128xf32> to vector<8x32xf32>
    %76 = arith.mulf %73, %60 : vector<8x32xf32>
    %77 = arith.mulf %72, %74 : vector<8x32xf32>
    %78 = arith.addf %76, %77 : vector<8x32xf32>
    %79 = math.tanh %78 : vector<8x32xf32>
    %80 = arith.mulf %75, %79 : vector<8x32xf32>
    %81 = vector.extract_strided_slice %5 {offsets = [32, 0], sizes = [8, 128], strides = [1, 1]} : vector<64x128xf32> to vector<8x128xf32>
    %cst_19 = arith.constant dense<0.000000e+00> : vector<8x128xf32>
    %82 = tpu.matmul %80, %6, %cst_19 {dimension_numbers = #tpu.dot_dimension_numbers<[1], [0], [0], [1], [0, 0, 1, 1], [], []>} : vector<8x32xf32>, vector<32x128xf32>, vector<8x128xf32> -> vector<8x128xf32>
    %83 = arith.addf %81, %82 : vector<8x128xf32>
    %84 = arith.negf %83 : vector<8x128xf32>
    %85 = math.exp %84 : vector<8x128xf32>
    %cst_20 = arith.constant 1.000000e+00 : f32
    %86 = vector.broadcast %cst_20 : f32 to vector<8x128xf32>
    %87 = arith.addf %86, %85 : vector<8x128xf32>
    %88 = arith.divf %86, %87 : vector<8x128xf32>
    %89 = math.tanh %83 : vector<8x128xf32>
    %90 = vector.extract_strided_slice %88 {offsets = [0, 0], sizes = [8, 32], strides = [1, 1]} : vector<8x128xf32> to vector<8x32xf32>
    %91 = vector.extract_strided_slice %88 {offsets = [0, 32], sizes = [8, 32], strides = [1, 1]} : vector<8x128xf32> to vector<8x32xf32>
    %92 = vector.extract_strided_slice %89 {offsets = [0, 64], sizes = [8, 32], strides = [1, 1]} : vector<8x128xf32> to vector<8x32xf32>
    %93 = vector.extract_strided_slice %88 {offsets = [0, 96], sizes = [8, 32], strides = [1, 1]} : vector<8x128xf32> to vector<8x32xf32>
    %94 = arith.mulf %91, %78 : vector<8x32xf32>
    %95 = arith.mulf %90, %92 : vector<8x32xf32>
    %96 = arith.addf %94, %95 : vector<8x32xf32>
    %97 = math.tanh %96 : vector<8x32xf32>
    %98 = arith.mulf %93, %97 : vector<8x32xf32>
    %99 = vector.extract_strided_slice %5 {offsets = [40, 0], sizes = [8, 128], strides = [1, 1]} : vector<64x128xf32> to vector<8x128xf32>
    %cst_21 = arith.constant dense<0.000000e+00> : vector<8x128xf32>
    %100 = tpu.matmul %98, %6, %cst_21 {dimension_numbers = #tpu.dot_dimension_numbers<[1], [0], [0], [1], [0, 0, 1, 1], [], []>} : vector<8x32xf32>, vector<32x128xf32>, vector<8x128xf32> -> vector<8x128xf32>
    %101 = arith.addf %99, %100 : vector<8x128xf32>
    %102 = arith.negf %101 : vector<8x128xf32>
    %103 = math.exp %102 : vector<8x128xf32>
    %cst_22 = arith.constant 1.000000e+00 : f32
    %104 = vector.broadcast %cst_22 : f32 to vector<8x128xf32>
    %105 = arith.addf %104, %103 : vector<8x128xf32>
    %106 = arith.divf %104, %105 : vector<8x128xf32>
    %107 = math.tanh %101 : vector<8x128xf32>
    %108 = vector.extract_strided_slice %106 {offsets = [0, 0], sizes = [8, 32], strides = [1, 1]} : vector<8x128xf32> to vector<8x32xf32>
    %109 = vector.extract_strided_slice %106 {offsets = [0, 32], sizes = [8, 32], strides = [1, 1]} : vector<8x128xf32> to vector<8x32xf32>
    %110 = vector.extract_strided_slice %107 {offsets = [0, 64], sizes = [8, 32], strides = [1, 1]} : vector<8x128xf32> to vector<8x32xf32>
    %111 = vector.extract_strided_slice %106 {offsets = [0, 96], sizes = [8, 32], strides = [1, 1]} : vector<8x128xf32> to vector<8x32xf32>
    %112 = arith.mulf %109, %96 : vector<8x32xf32>
    %113 = arith.mulf %108, %110 : vector<8x32xf32>
    %114 = arith.addf %112, %113 : vector<8x32xf32>
    %115 = math.tanh %114 : vector<8x32xf32>
    %116 = arith.mulf %111, %115 : vector<8x32xf32>
    %117 = vector.extract_strided_slice %5 {offsets = [48, 0], sizes = [8, 128], strides = [1, 1]} : vector<64x128xf32> to vector<8x128xf32>
    %cst_23 = arith.constant dense<0.000000e+00> : vector<8x128xf32>
    %118 = tpu.matmul %116, %6, %cst_23 {dimension_numbers = #tpu.dot_dimension_numbers<[1], [0], [0], [1], [0, 0, 1, 1], [], []>} : vector<8x32xf32>, vector<32x128xf32>, vector<8x128xf32> -> vector<8x128xf32>
    %119 = arith.addf %117, %118 : vector<8x128xf32>
    %120 = arith.negf %119 : vector<8x128xf32>
    %121 = math.exp %120 : vector<8x128xf32>
    %cst_24 = arith.constant 1.000000e+00 : f32
    %122 = vector.broadcast %cst_24 : f32 to vector<8x128xf32>
    %123 = arith.addf %122, %121 : vector<8x128xf32>
    %124 = arith.divf %122, %123 : vector<8x128xf32>
    %125 = math.tanh %119 : vector<8x128xf32>
    %126 = vector.extract_strided_slice %124 {offsets = [0, 0], sizes = [8, 32], strides = [1, 1]} : vector<8x128xf32> to vector<8x32xf32>
    %127 = vector.extract_strided_slice %124 {offsets = [0, 32], sizes = [8, 32], strides = [1, 1]} : vector<8x128xf32> to vector<8x32xf32>
    %128 = vector.extract_strided_slice %125 {offsets = [0, 64], sizes = [8, 32], strides = [1, 1]} : vector<8x128xf32> to vector<8x32xf32>
    %129 = vector.extract_strided_slice %124 {offsets = [0, 96], sizes = [8, 32], strides = [1, 1]} : vector<8x128xf32> to vector<8x32xf32>
    %130 = arith.mulf %127, %114 : vector<8x32xf32>
    %131 = arith.mulf %126, %128 : vector<8x32xf32>
    %132 = arith.addf %130, %131 : vector<8x32xf32>
    %133 = math.tanh %132 : vector<8x32xf32>
    %134 = arith.mulf %129, %133 : vector<8x32xf32>
    %135 = vector.extract_strided_slice %5 {offsets = [56, 0], sizes = [8, 128], strides = [1, 1]} : vector<64x128xf32> to vector<8x128xf32>
    %cst_25 = arith.constant dense<0.000000e+00> : vector<8x128xf32>
    %136 = tpu.matmul %134, %6, %cst_25 {dimension_numbers = #tpu.dot_dimension_numbers<[1], [0], [0], [1], [0, 0, 1, 1], [], []>} : vector<8x32xf32>, vector<32x128xf32>, vector<8x128xf32> -> vector<8x128xf32>
    %137 = arith.addf %135, %136 : vector<8x128xf32>
    %138 = arith.negf %137 : vector<8x128xf32>
    %139 = math.exp %138 : vector<8x128xf32>
    %cst_26 = arith.constant 1.000000e+00 : f32
    %140 = vector.broadcast %cst_26 : f32 to vector<8x128xf32>
    %141 = arith.addf %140, %139 : vector<8x128xf32>
    %142 = arith.divf %140, %141 : vector<8x128xf32>
    %143 = math.tanh %137 : vector<8x128xf32>
    %144 = vector.extract_strided_slice %142 {offsets = [0, 0], sizes = [8, 32], strides = [1, 1]} : vector<8x128xf32> to vector<8x32xf32>
    %145 = vector.extract_strided_slice %142 {offsets = [0, 32], sizes = [8, 32], strides = [1, 1]} : vector<8x128xf32> to vector<8x32xf32>
    %146 = vector.extract_strided_slice %143 {offsets = [0, 64], sizes = [8, 32], strides = [1, 1]} : vector<8x128xf32> to vector<8x32xf32>
    %147 = vector.extract_strided_slice %142 {offsets = [0, 96], sizes = [8, 32], strides = [1, 1]} : vector<8x128xf32> to vector<8x32xf32>
    %148 = arith.mulf %145, %132 : vector<8x32xf32>
    %149 = arith.mulf %144, %146 : vector<8x32xf32>
    %150 = arith.addf %148, %149 : vector<8x32xf32>
    %151 = math.tanh %150 : vector<8x32xf32>
    %152 = arith.mulf %147, %151 : vector<8x32xf32>
    %c0_27 = arith.constant 0 : index
    %c0_28 = arith.constant 0 : index
    %153 = vector.load %arg8[%c0_27, %c0_28] : memref<8x32xf32, #tpu.memory_space<vmem>>, vector<8x32xf32>
    tpu.vector_store %arg8[%c0_27, %c0_28], %152 {strides = array<i32>} : memref<8x32xf32, #tpu.memory_space<vmem>>, vector<8x32xf32>,
    %c0_29 = arith.constant 0 : index
    %c0_30 = arith.constant 0 : index
    %154 = vector.load %arg9[%c0_29, %c0_30] : memref<8x32xf32, #tpu.memory_space<vmem>>, vector<8x32xf32>
    tpu.vector_store %arg9[%c0_29, %c0_30], %150 {strides = array<i32>} : memref<8x32xf32, #tpu.memory_space<vmem>>, vector<8x32xf32>,
    %c0_31 = arith.constant 0 : index
    %c0_32 = arith.constant 0 : index
    %155 = vector.load %arg6[%c0_31, %c0_32] : memref<32x128xf32, #tpu.memory_space<vmem>>, vector<32x128xf32>
    %cst_33 = arith.constant dense<0.000000e+00> : vector<8x128xf32>
    %156 = tpu.matmul %152, %155, %cst_33 {dimension_numbers = #tpu.dot_dimension_numbers<[1], [0], [0], [1], [0, 0, 1, 1], [], []>} : vector<8x32xf32>, vector<32x128xf32>, vector<8x128xf32> -> vector<8x128xf32>
    %c0_34 = arith.constant 0 : index
    %c0_35 = arith.constant 0 : index
    %157 = vector.load %arg7[%c0_34, %c0_35] : memref<1x128xf32, #tpu.memory_space<vmem>>, vector<1x128xf32>
    %158 = vector.broadcast %157 : vector<1x128xf32> to vector<8x128xf32>
    %159 = arith.addf %156, %158 : vector<8x128xf32>
    %c0_36 = arith.constant 0 : index
    %c0_37 = arith.constant 0 : index
    %160 = vector.load %arg10[%c0_36, %c0_37] : memref<8x128xf32, #tpu.memory_space<vmem>>, vector<8x128xf32>
    tpu.vector_store %arg10[%c0_36, %c0_37], %159 {strides = array<i32>} : memref<8x128xf32, #tpu.memory_space<vmem>>, vector<8x128xf32>,
    return
  }
}

</mosaic_0001>

<bundles_post_ra>
// kernel: tpu_custom_call.1
= control target key start
LH: loop header
LB: loop body
LE: loop exit
PB: predicated region body
PF: predicated region fallthrough
CT: control target
= control target key end

     0   :  { %16 = vsyncpa [#allocation3], 0  ;;  %s1915_s0 = inlined_call_operand.vmem [shape: f32[64,16], index: 0, kind: input, shape index: {}]   ;;  %s1916_s1 = inlined_call_operand.hbm [shape: f32[8,32], index: 1, kind: input, shape index: {}]   ;;  %s1917_s2 = inlined_call_operand.hbm [shape: f32[8,32], index: 2, kind: input, shape index: {}]   ;;  %s1918_s3 = inlined_call_operand.vmem [shape: f32[16,128], index: 3, kind: input, shape index: {}]   ;;  %s1919_s4 = inlined_call_operand.vmem [shape: f32[32,128], index: 4, kind: input, shape index: {}]   ;;  %s1920_s5 = inlined_call_operand.vmem [shape: f32[1,128], index: 5, kind: input, shape index: {}]   ;;  %s1921_s6 = inlined_call_operand.vmem [shape: f32[32,128], index: 6, kind: input, shape index: {}]   ;;  %s1922_s7 = inlined_call_operand.vmem [shape: f32[1,128], index: 7, kind: input, shape index: {}]   ;;  %s1923_s8 = inlined_call_operand.hbm [shape: f32[8,32], index: 8, kind: output, shape index: {0}]   ;;  %s1924_s9 = inlined_call_operand.hbm [shape: f32[8,32], index: 9, kind: output, shape index: {1}]   ;;  %s1925_s10 = inlined_call_operand.hbm [shape: f32[8,128], index: 10, kind: output, shape index: {2}]  }
   0x1   :  { %17 = vsyncpa [#allocation6], 0 }
   0x2   :  { %18 = vsyncpa [#allocation4], 0 }
   0x3   :  { %19 = vsyncpa [#allocation9], 0  ;;  %s1599_s13 = smov [#allocation2]   ;;  %s1600_s15 = smov [#allocation5]  }
   0x4   :  { %s28_s14 = sshll.u32 %s1599_s13, 4  ;;  %s38_s16 = sshll.u32 %s1600_s15, 4  ;;  %s29_s14 = int_to_ptr.vmem [resolvable:$true] %s28_s14  ;;  %s39_s16 = int_to_ptr.vmem [resolvable:$true] %s38_s16 }
   0x5   :  { %s1481_s19 = scalar_lea.hbm %s1916_s1, 128 }
   0x6   :  { %p1482_p0 = scmp.ne.s32.totalorder %s1916_s1, %s1481_s19  ;;  %p1485_p1 = scmp.lt.u32.totalorder %s1481_s19, %s1916_s1 }
   0x8   :  { %p1487_p2 = pnand %p1485_p1, %p1482_p0 }
   0xa   :  { %1490 = shalt.err (!%p1487_p2)
}
   0xb   :  { %s1491_s24 = scalar_lea.vmem %s29_s14, 128  ;;  %p1496_p4 = scmp.lt.s32.totalorder %s29_s14, %s29_s14 }
   0xc   :  { %p1492_p3 = scmp.ne.s32.totalorder %s29_s14, %s1491_s24  ;;  %p1497_p5 = scmp.lt.s32.totalorder %s1491_s24, %s1491_s24 }
   0xe   :  { %p1498_p6 = por %p1497_p5, %p1496_p4 }
  0x10   :  { %p1499_p7 = pnand %p1498_p6, %p1492_p3 }
  0x12   :  { %1502 = shalt.err (!%p1499_p7)
}
  0x13   :  { %31 = dma.hbm_to_vmem [thread:$0]  %s1916_s1, 128, %s29_s14, [#allocation3]  }
  0x14   :  { %s1503_s29 = scalar_lea.hbm %s1917_s2, 128 }
  0x15   :  { %p1504_p8 = scmp.ne.s32.totalorder %s1917_s2, %s1503_s29  ;;  %p1507_p9 = scmp.lt.u32.totalorder %s1503_s29, %s1917_s2 }
  0x17   :  { %p1509_p10 = pnand %p1507_p9, %p1504_p8 }
  0x19   :  { %1512 = shalt.err (!%p1509_p10)
}
  0x1a   :  { %s1513_s15 = scalar_lea.vmem %s39_s16, 128  ;;  %p1518_p12 = scmp.lt.s32.totalorder %s39_s16, %s39_s16 }
  0x1b   :  { %p1514_p11 = scmp.ne.s32.totalorder %s39_s16, %s1513_s15  ;;  %p1519_p13 = scmp.lt.s32.totalorder %s1513_s15, %s1513_s15 }
  0x1d   :  { %p1520_p0 = por %p1519_p13, %p1518_p12 }
  0x1f   :  { %p1521_p1 = pnand %p1520_p0, %p1514_p11 }
  0x21   :  { %1524 = shalt.err (!%p1521_p1)
}
  0x22   :  { %41 = dma.hbm_to_vmem [thread:$0]  %s1917_s2, 128, %s39_s16, [#allocation6]  }
  0x23   :  { %1591 = dma.done.wait [#allocation3], 128  }
  0x24   :  { %1592 = vsyncadd [#allocation3], 4294967168 }
  0x25   :  { %1593 = dma.done.wait [#allocation6], 128  }
  0x26   :  { %1594 = vsyncadd [#allocation6], 4294967168  ;;  %v1601_v0 = vmov 0.0|0.0   ;;  %vm1602_vm0 = vmmov 0   ;;  %v1603_v1 = vmov 0.0   ;;  %vm75_vm1 = vcmask 130048  }
  0x27   :  { %1352 = vmatprep.subr.bf16.mxu1 %v1601_v0  ;;  %1257 = vmatprep.mubr.msk.f32.mxu1 %vm1602_vm0, %v1603_v1  ;;  %v66_v2 = vld [vmem:[%s1918_s3] sm:$0xff]  ;;  %v67_v3 = vld [vmem:[%s1918_s3 + $0x8] sm:$0xff]  ;;  %v207_v9 = vld [vmem:[%s1919_s4 + $0x10] sm:$0xff]  ;;  %vm211_vm2 = vcmask 261120   ;;  %s1604_s11 = smov 64   ;;  %s1605_s12 = smov 32  }
  0x28   :  { %v205_v4 = vld [vmem:[%s1919_s4] sm:$0xff]  ;;  %v1348_v5 = vpack.c.bf16 %v67_v3, %v66_v2  ;;  %v206_v6 = vld [vmem:[%s1919_s4 + $0x8] sm:$0xff]  ;;  %v208_v10 = vld [vmem:[%s1919_s4 + $0x18] sm:$0xff]  ;;  %s1606_s28 = smov 96   ;;  %s1608_s4 = smov [#allocation7]  }
  0x29   :  { %v58_v7 = vld [vmem:[%s1915_s0] sm:$0xff]  ;;  %v1707_v8 = vpack.c.bf16 %v206_v6, %v205_v4  ;;  %v59_v11 = vld [vmem:[%s1915_s0 + $0x8] sm:$0xff]  ;;  %v1720_v12 = vpack.c.bf16 %v208_v10, %v207_v9  ;;  %v60_v51 = vld [vmem:[%s1915_s0 + $0x10] sm:$0xff]  ;;  %s1114_s30 = sshll.u32 %s1608_s4, 4  ;;  %s1115_s30 = int_to_ptr.vmem [resolvable:$true] %s1114_s30 }
  0x2a   :  { %1237 = vmatprep.mubr.msk.f32.mxu0 %vm75_vm1, %v58_v7  ;;  %1349 = vmatprep.subr.bf16.mxu0 %v1348_v5  ;;  %v209_v13 = vld [vmem:[#allocation2] sm:$0xff]  ;;  %v210_v22 = vld [vmem:[#allocation5] sm:$0xff]  ;;  %v61_v52 = vld [vmem:[%s1915_s0 + $0x18] sm:$0xff] }
  0x2b   :  { %1354 = vmatpush3.bf16.msra.mxu1 %v1707_v8  ;;  %1351 = vmatpush3.bf16.msra.mxu0 %v1348_v5  ;;  %v1741_v14 = vld [vmem:[%s1920_s5] ss:$0 sm:$0xff]  ;;  %v63_v54 = vld [vmem:[%s1915_s0 + $0x28] sm:$0xff]  ;;  %v64_v55 = vld [vmem:[%s1915_s0 + $0x30] sm:$0xff] }
  0x2c   :  { %1355 = vmatprep.subr.bf16.mxu1 %v1601_v0  ;;  %1364 = vmatprep.subr.bf16.mxu0 %v1601_v0  ;;  %v62_v53 = vld [vmem:[%s1915_s0 + $0x20] sm:$0xff]  ;;  %v65_v56 = vld [vmem:[%s1915_s0 + $0x38] sm:$0xff] }
  0x2e   :  { %1238 = vmatmul.mubr.msk.f32.vlgmr.msra.gmra.mrb[0].mxu0 %vm75_vm1, %v59_v11 }
  0x2f   :  { %1357 = vmatpush3.bf16.msra.mxu1 %v1720_v12  ;;  %1366 = vmatpush3.bf16.msra.mxu0 %v1707_v8 }
  0x30   :  { %1358 = vmatprep.subr.bf16.mxu1 %v1601_v0  ;;  %1367 = vmatprep.subr.bf16.mxu0 %v1601_v0 }
  0x31   :  { %1240 = vmatprep.mubr.msk.f32.mxu0 %vm75_vm1, %v60_v51 }
  0x32   :  { %1258 = vmatmul.mubr.msk.f32.vlgmr.msra.gmra.mrb[0].mxu1 %vm211_vm2, %v209_v13  ;;  %1241 = vmatmul.mubr.msk.f32.gmra.mrb[2].mxu0 %vm75_vm1, %v61_v52 }
  0x33   :  { %1360 = vmatpush3.bf16.msra.mxu1 %v1707_v8  ;;  %1268 = vmatprep.mubr.msk.f32.mxu1 %vm1602_vm0, %v1603_v1 }
  0x34   :  { %1361 = vmatprep.subr.bf16.mxu1 %v1601_v0  ;;  %1369 = vmatpush3.bf16.msra.mxu0 %v1720_v12 }
  0x35   :  { %1376 = vmatprep.subr.bf16.mxu0 %v1601_v0  ;;  %1243 = vmatprep.mubr.msk.f32.mxu0 %vm75_vm1, %v62_v53 }
  0x36   :  { %1244 = vmatmul.mubr.msk.f32.gmra.mrb[4].mxu0 %vm75_vm1, %v63_v54 }
  0x37   :  { %1363 = vmatpush3.bf16.msra.mxu1 %v1720_v12  ;;  %1246 = vmatprep.mubr.msk.f32.mxu0 %vm75_vm1, %v64_v55 }
  0x38   :  { %1370 = vmatprep.subr.bf16.mxu1 %v1601_v0 }
  0x3a   :  { %1247 = vmatmul.mubr.msk.f32.gmra.mrb[6].mxu0 %vm75_vm1, %v65_v56 }
  0x3b   :  { %1279 = vmatprep.mubr.msk.f32.mxu0 %vm1602_vm0, %v1603_v1 }
 0x101   :  { %v1239_v15 = vpop.f32.mrb[0].mxu0 }
 0x102   :  { %v166_v16 = vpop.f32.mrb[1].mxu0  ;;  %v172_v37 = vadd.f32 %v1239_v15, %v1741_v14 }
 0x103   :  { %v167_v17 = vadd.f32 %v1741_v14, %v166_v16 }
 0x105   :  { %v281_v18 = vpop.f32.mrb[0].mxu1  ;;  %v1242_v60 = vpop.f32.mrb[2].mxu0 }
 0x106   :  { %v285_v19 = vadd.f32 %v281_v18, %v167_v17  ;;  %v1259_v20 = vpop.f32.mrb[1].mxu1  ;;  %v176_v61 = vpop.f32.mrb[3].mxu0 }
 0x107   :  { %v177_v5 = vadd.f32 %v1741_v14, %v176_v61 }
 0x108   :  { %1417 = vtanh.f32 %v285_v19  ;;  %v1161_v23 = vmul.f32 -1.442695, %v285_v19 }
 0x109   :  { %v1787_v62 = vpop.f32.mrb[4].mxu0 }
 0x10a   :  { %1419 = vpow2.f32 %v1161_v23  ;;  %v1789_v63 = vpop.f32.mrb[5].mxu0 }
 0x10d   :  { %v1791_v2 = vpop.f32.mrb[6].mxu0 }
 0x10e   :  { %v1793_v3 = vpop.f32.mrb[7].mxu0 }
 0x112   :  { %v1418_v21 = vpop.eup %1417 }
 0x113   :  { %299 = vrot.lane.b32.xlu0 %v1418_v21, %s1604_s11 }
 0x114   :  { %v1420_v24 = vpop.eup %1419 }
 0x115   :  { %v289_v25 = vadd.f32 1.0, %v1420_v24 }
 0x117   :  { %294 = vrot.lane.b32.xlu0 %v210_v22, %s1605_s12  ;;  %1421 = vrcp.f32 %v289_v25 }
 0x121   :  { %v1422_v26 = vpop.eup %1421 }
 0x185   :  { %v300_v27 = vpop.permute.xlu0 %299 }
 0x186   :  { %v302_v28 = vmul.f32 %v1422_v26, %v300_v27 }
 0x188   :  { %304 = vrot.lane.b32.xlu1 %v302_v28, %s1605_s12 }
 0x189   :  { %v295_v29 = vpop.permute.xlu0 %294 }
 0x18a   :  { %v297_v30 = vmul.f32 %v1422_v26, %v295_v29 }
 0x1fa   :  { %v305_v31 = vpop.permute.xlu1 %304 }
 0x1fb   :  { %v307_v32 = vadd.f32 %v305_v31, %v297_v30 }
 0x1fd   :  { %1423 = vtanh.f32 %v307_v32 }
 0x207   :  { %v1424_v33 = vpop.eup %1423 }
 0x208   :  { %310 = vrot.lane.b32.xlu1 %v1424_v33, %s1604_s11 }
 0x27a   :  { %v311_v34 = vpop.permute.xlu1 %310 }
 0x27b   :  { %v313_v35 = vmul.f32 %v1422_v26, %v311_v34  ;;  %v182_v26 = vadd.f32 %v1242_v60, %v1741_v14 }
 0x27d   :  { %315 = vrot.lane.b32.xlu0 %v313_v35, %s1605_s12 }
 0x2ef   :  { %v316_v36 = vpop.permute.xlu0 %315 }
 0x2f0   :  { %1269 = vmatmul.mubr.msk.f32.vlgmr.msra.gmra.mrb[2].mxu1 %vm211_vm2, %v316_v36 }
 0x2f1   :  { %1372 = vmatpush3.bf16.msra.mxu1 %v1707_v8  ;;  %1290 = vmatprep.mubr.msk.f32.mxu1 %vm1602_vm0, %v1603_v1 }
 0x2f2   :  { %1373 = vmatprep.subr.bf16.mxu1 %v1601_v0 }
 0x2f5   :  { %1375 = vmatpush3.bf16.msra.mxu1 %v1720_v12 }
 0x2f6   :  { %1382 = vmatprep.subr.bf16.mxu1 %v1601_v0 }
 0x3c3   :  { %v385_v38 = vpop.f32.mrb[2].mxu1 }
 0x3c4   :  { %v389_v39 = vadd.f32 %v385_v38, %v172_v37  ;;  %v1270_v40 = vpop.f32.mrb[3].mxu1 }
 0x3c6   :  { %1425 = vtanh.f32 %v389_v39  ;;  %v1163_v42 = vmul.f32 -1.442695, %v389_v39 }
 0x3c8   :  { %1427 = vpow2.f32 %v1163_v42 }
 0x3d0   :  { %v1426_v41 = vpop.eup %1425 }
 0x3d1   :  { %399 = vrot.lane.b32.xlu1 %v1426_v41, %s1604_s11 }
 0x3d2   :  { %v1428_v43 = vpop.eup %1427 }
 0x3d3   :  { %v393_v44 = vadd.f32 1.0, %v1428_v43 }
 0x3d5   :  { %1429 = vrcp.f32 %v393_v44  ;;  %v187_v44 = vadd.f32 %v1741_v14, %v1789_v63  ;;  %v192_v63 = vadd.f32 %v1787_v62, %v1741_v14 }
 0x3df   :  { %v1430_v45 = vpop.eup %1429 }
 0x3e0   :  { %v397_v48 = vmul.f32 %v1430_v45, %v307_v32 }
 0x443   :  { %v400_v46 = vpop.permute.xlu1 %399 }
 0x444   :  { %v402_v47 = vmul.f32 %v1430_v45, %v400_v46 }
 0x446   :  { %404 = vrot.lane.b32.xlu0 %v402_v47, %s1605_s12 }
 0x4b8   :  { %v405_v49 = vpop.permute.xlu0 %404 }
 0x4b9   :  { %v407_v50 = vadd.f32 %v405_v49, %v397_v48 }
 0x4bb   :  { %1431 = vtanh.f32 %v407_v50 }
 0x4c5   :  { %v1432_v57 = vpop.eup %1431 }
 0x4c6   :  { %410 = vrot.lane.b32.xlu1 %v1432_v57, %s1604_s11 }
 0x538   :  { %v411_v58 = vpop.permute.xlu1 %410 }
 0x539   :  { %v413_v59 = vmul.f32 %v1430_v45, %v411_v58 }
 0x53b   :  { %415 = vrot.lane.b32.xlu0 %v413_v59, %s1605_s12 }
 0x5ad   :  { %v416_v4 = vpop.permute.xlu0 %415 }
 0x5ae   :  { %1280 = vmatmul.mubr.msk.f32.vlgmr.msra.gmra.mrb[8].mxu0 %vm211_vm2, %v416_v4 }
 0x5af   :  { %1378 = vmatpush3.bf16.msra.mxu0 %v1707_v8  ;;  %1301 = vmatprep.mubr.msk.f32.mxu0 %vm1602_vm0, %v1603_v1 }
 0x5b0   :  { %1379 = vmatprep.subr.bf16.mxu0 %v1601_v0 }
 0x5b3   :  { %1381 = vmatpush3.bf16.msra.mxu0 %v1720_v12 }
 0x5b4   :  { %1388 = vmatprep.subr.bf16.mxu0 %v1601_v0 }
 0x681   :  { %v485_v6 = vpop.f32.mrb[8].mxu0 }
 0x682   :  { %v489_v7 = vadd.f32 %v485_v6, %v177_v5  ;;  %v1281_v9 = vpop.f32.mrb[9].mxu0 }
 0x684   :  { %1433 = vtanh.f32 %v489_v7  ;;  %v1165_v11 = vmul.f32 -1.442695, %v489_v7 }
 0x686   :  { %1435 = vpow2.f32 %v1165_v11 }
 0x68e   :  { %v1434_v10 = vpop.eup %1433 }
 0x68f   :  { %499 = vrot.lane.b32.xlu1 %v1434_v10, %s1604_s11 }
 0x690   :  { %v1436_v13 = vpop.eup %1435 }
 0x691   :  { %v493_v15 = vadd.f32 1.0, %v1436_v13 }
 0x693   :  { %1437 = vrcp.f32 %v493_v15 }
 0x69d   :  { %v1438_v16 = vpop.eup %1437 }
 0x69e   :  { %v497_v19 = vmul.f32 %v1438_v16, %v407_v50 }
 0x701   :  { %v500_v17 = vpop.permute.xlu1 %499 }
 0x702   :  { %v502_v18 = vmul.f32 %v1438_v16, %v500_v17 }
 0x704   :  { %504 = vrot.lane.b32.xlu0 %v502_v18, %s1605_s12 }
 0x776   :  { %v505_v20 = vpop.permute.xlu0 %504 }
 0x777   :  { %v507_v21 = vadd.f32 %v505_v20, %v497_v19 }
 0x779   :  { %1439 = vtanh.f32 %v507_v21 }
 0x783   :  { %v1440_v22 = vpop.eup %1439 }
 0x784   :  { %510 = vrot.lane.b32.xlu1 %v1440_v22, %s1604_s11 }
 0x7f6   :  { %v511_v23 = vpop.permute.xlu1 %510 }
 0x7f7   :  { %v513_v24 = vmul.f32 %v1438_v16, %v511_v23 }
 0x7f9   :  { %515 = vrot.lane.b32.xlu0 %v513_v24, %s1605_s12 }
 0x86b   :  { %v516_v25 = vpop.permute.xlu0 %515 }
 0x86c   :  { %1291 = vmatmul.mubr.msk.f32.vlgmr.msra.gmra.mrb[4].mxu1 %vm211_vm2, %v516_v25 }
 0x86d   :  { %1384 = vmatpush3.bf16.msra.mxu1 %v1707_v8  ;;  %1312 = vmatprep.mubr.msk.f32.mxu1 %vm1602_vm0, %v1603_v1 }
 0x86e   :  { %1385 = vmatprep.subr.bf16.mxu1 %v1601_v0 }
 0x871   :  { %1387 = vmatpush3.bf16.msra.mxu1 %v1720_v12 }
 0x872   :  { %1394 = vmatprep.subr.bf16.mxu1 %v1601_v0 }
 0x93f   :  { %v585_v27 = vpop.f32.mrb[4].mxu1 }
 0x940   :  { %v589_v28 = vadd.f32 %v585_v27, %v182_v26  ;;  %v1292_v29 = vpop.f32.mrb[5].mxu1 }
 0x942   :  { %1441 = vtanh.f32 %v589_v28  ;;  %v1167_v31 = vmul.f32 -1.442695, %v589_v28 }
 0x944   :  { %1443 = vpow2.f32 %v1167_v31 }
 0x94c   :  { %v1442_v30 = vpop.eup %1441 }
 0x94d   :  { %599 = vrot.lane.b32.xlu1 %v1442_v30, %s1604_s11 }
 0x94e   :  { %v1444_v32 = vpop.eup %1443 }
 0x94f   :  { %v593_v33 = vadd.f32 1.0, %v1444_v32 }
 0x951   :  { %1445 = vrcp.f32 %v593_v33 }
 0x95b   :  { %v1446_v34 = vpop.eup %1445 }
 0x95c   :  { %v597_v37 = vmul.f32 %v1446_v34, %v507_v21  ;;  %v197_v21 = vadd.f32 %v1741_v14, %v1793_v3 }
 0x9bf   :  { %v600_v35 = vpop.permute.xlu1 %599 }
 0x9c0   :  { %v602_v36 = vmul.f32 %v1446_v34, %v600_v35 }
 0x9c2   :  { %604 = vrot.lane.b32.xlu0 %v602_v36, %s1605_s12 }
 0xa34   :  { %v605_v38 = vpop.permute.xlu0 %604 }
 0xa35   :  { %v607_v39 = vadd.f32 %v605_v38, %v597_v37  ;;  %v202_v37 = vadd.f32 %v1791_v2, %v1741_v14  ;;  %v1024_v2 = vld [vmem:[%s1921_s6] sm:$0xff] }
 0xa37   :  { %1447 = vtanh.f32 %v607_v39 }
 0xa41   :  { %v1448_v40 = vpop.eup %1447 }
 0xa42   :  { %610 = vrot.lane.b32.xlu1 %v1448_v40, %s1604_s11 }
 0xab4   :  { %v611_v41 = vpop.permute.xlu1 %610 }
 0xab5   :  { %v613_v42 = vmul.f32 %v1446_v34, %v611_v41 }
 0xab7   :  { %615 = vrot.lane.b32.xlu0 %v613_v42, %s1605_s12 }
 0xb29   :  { %v616_v43 = vpop.permute.xlu0 %615 }
 0xb2a   :  { %1302 = vmatmul.mubr.msk.f32.vlgmr.msra.gmra.mrb[10].mxu0 %vm211_vm2, %v616_v43 }
 0xb2b   :  { %1390 = vmatpush3.bf16.msra.mxu0 %v1707_v8  ;;  %1323 = vmatprep.mubr.msk.f32.mxu0 %vm1602_vm0, %v1603_v1 }
 0xb2c   :  { %1391 = vmatprep.subr.bf16.mxu0 %v1601_v0 }
 0xb2f   :  { %1393 = vmatpush3.bf16.msra.mxu0 %v1720_v12 }
 0xb30   :  { %1400 = vmatprep.subr.bf16.mxu0 %v1601_v0 }
 0xbfd   :  { %v685_v45 = vpop.f32.mrb[10].mxu0 }
 0xbfe   :  { %v689_v46 = vadd.f32 %v685_v45, %v187_v44  ;;  %v1303_v47 = vpop.f32.mrb[11].mxu0 }
 0xc00   :  { %1449 = vtanh.f32 %v689_v46  ;;  %v1169_v49 = vmul.f32 -1.442695, %v689_v46 }
 0xc02   :  { %1451 = vpow2.f32 %v1169_v49 }
 0xc0a   :  { %v1450_v48 = vpop.eup %1449 }
 0xc0b   :  { %699 = vrot.lane.b32.xlu1 %v1450_v48, %s1604_s11 }
 0xc0c   :  { %v1452_v50 = vpop.eup %1451 }
 0xc0d   :  { %v693_v51 = vadd.f32 1.0, %v1452_v50  ;;  %v1025_v50 = vld [vmem:[%s1921_s6 + $0x8] sm:$0xff] }
 0xc0f   :  { %1453 = vrcp.f32 %v693_v51  ;;  %v1026_v51 = vld [vmem:[%s1921_s6 + $0x10] sm:$0xff] }
 0xc19   :  { %v1454_v52 = vpop.eup %1453 }
 0xc1a   :  { %v697_v55 = vmul.f32 %v1454_v52, %v607_v39 }
 0xc7d   :  { %v700_v53 = vpop.permute.xlu1 %699 }
 0xc7e   :  { %v702_v54 = vmul.f32 %v1454_v52, %v700_v53  ;;  %v1027_v53 = vld [vmem:[%s1921_s6 + $0x18] sm:$0xff]  ;;  %s1607_s6 = smov [#allocation8]  }
 0xc7f   :  { %s1124_s29 = sshll.u32 %s1607_s6, 4  ;;  %s1125_s29 = int_to_ptr.vmem [resolvable:$true] %s1124_s29 }
 0xc80   :  { %704 = vrot.lane.b32.xlu0 %v702_v54, %s1605_s12  ;;  %v1404_v54 = vpack.c.bf16 %v1027_v53, %v1026_v51  ;;  %p1530_p3 = scmp.lt.s32.totalorder %s1125_s29, %s1125_s29 }
 0xcf2   :  { %v705_v56 = vpop.permute.xlu0 %704 }
 0xcf3   :  { %v707_v57 = vadd.f32 %v705_v56, %v697_v55 }
 0xcf5   :  { %1455 = vtanh.f32 %v707_v57 }
 0xcff   :  { %v1456_v58 = vpop.eup %1455 }
 0xd00   :  { %710 = vrot.lane.b32.xlu1 %v1456_v58, %s1604_s11 }
 0xd72   :  { %v711_v59 = vpop.permute.xlu1 %710 }
 0xd73   :  { %v713_v60 = vmul.f32 %v1454_v52, %v711_v59  ;;  %v1401_v52 = vpack.c.bf16 %v1025_v50, %v1024_v2 }
 0xd75   :  { %715 = vrot.lane.b32.xlu0 %v713_v60, %s1605_s12 }
 0xde7   :  { %v716_v61 = vpop.permute.xlu0 %715 }
 0xde8   :  { %1313 = vmatmul.mubr.msk.f32.vlgmr.msra.gmra.mrb[6].mxu1 %vm211_vm2, %v716_v61 }
 0xde9   :  { %1396 = vmatpush3.bf16.msra.mxu1 %v1707_v8  ;;  %1334 = vmatprep.mubr.msk.f32.mxu1 %vm1602_vm0, %v1603_v1 }
 0xdea   :  { %1397 = vmatprep.subr.bf16.mxu1 %v1601_v0 }
 0xded   :  { %1399 = vmatpush3.bf16.msra.mxu1 %v1720_v12 }
 0xebb   :  { %v785_v4 = vpop.f32.mrb[6].mxu1 }
 0xebc   :  { %v789_v5 = vadd.f32 %v785_v4, %v192_v63  ;;  %v1314_v6 = vpop.f32.mrb[7].mxu1 }
 0xebe   :  { %1457 = vtanh.f32 %v789_v5  ;;  %v1171_v9 = vmul.f32 -1.442695, %v789_v5 }
 0xec0   :  { %1459 = vpow2.f32 %v1171_v9 }
 0xec8   :  { %v1458_v7 = vpop.eup %1457 }
 0xec9   :  { %799 = vrot.lane.b32.xlu1 %v1458_v7, %s1604_s11 }
 0xeca   :  { %v1460_v8 = vpop.eup %1459 }
 0xecb   :  { %v793_v10 = vadd.f32 1.0, %v1460_v8 }
 0xecd   :  { %1461 = vrcp.f32 %v793_v10 }
 0xed7   :  { %v1462_v11 = vpop.eup %1461 }
 0xed8   :  { %v797_v12 = vmul.f32 %v1462_v11, %v707_v57 }
 0xf3b   :  { %v800_v13 = vpop.permute.xlu1 %799 }
 0xf3c   :  { %v802_v15 = vmul.f32 %v1462_v11, %v800_v13 }
 0xf3e   :  { %804 = vrot.lane.b32.xlu0 %v802_v15, %s1605_s12 }
 0xfb0   :  { %v805_v16 = vpop.permute.xlu0 %804 }
 0xfb1   :  { %v807_v62 = vadd.f32 %v805_v16, %v797_v12 }
 0xfb3   :  { %1463 = vtanh.f32 %v807_v62 }
 0xfbd   :  { %v1464_v17 = vpop.eup %1463 }
 0xfbe   :  { %810 = vrot.lane.b32.xlu1 %v1464_v17, %s1604_s11 }
0x1030   :  { %v811_v18 = vpop.permute.xlu1 %810 }
0x1031   :  { %v813_v19 = vmul.f32 %v1462_v11, %v811_v18 }
0x1033   :  { %815 = vrot.lane.b32.xlu0 %v813_v19, %s1605_s12 }
0x10a5   :  { %v816_v20 = vpop.permute.xlu0 %815 }
0x10a6   :  { %1324 = vmatmul.mubr.msk.f32.vlgmr.msra.gmra.mrb[12].mxu0 %vm211_vm2, %v816_v20 }
0x10a7   :  { %1345 = vmatprep.mubr.msk.f32.mxu0 %vm1602_vm0, %v1603_v1  ;;  %1402 = vmatpush3.bf16.msra.mxu0 %v1401_v52 }
0x10a8   :  { %1403 = vmatprep.subr.bf16.mxu0 %v1601_v0 }
0x10ab   :  { %1405 = vmatpush3.bf16.msra.mxu0 %v1404_v54 }
0x1179   :  { %v885_v22 = vpop.f32.mrb[12].mxu0 }
0x117a   :  { %v889_v23 = vadd.f32 %v885_v22, %v197_v21  ;;  %v1325_v24 = vpop.f32.mrb[13].mxu0 }
0x117c   :  { %1465 = vtanh.f32 %v889_v23  ;;  %v1173_v26 = vmul.f32 -1.442695, %v889_v23 }
0x117e   :  { %1467 = vpow2.f32 %v1173_v26 }
0x1186   :  { %v1466_v25 = vpop.eup %1465 }
0x1187   :  { %899 = vrot.lane.b32.xlu1 %v1466_v25, %s1604_s11 }
0x1188   :  { %v1468_v27 = vpop.eup %1467 }
0x1189   :  { %v893_v28 = vadd.f32 1.0, %v1468_v27 }
0x118b   :  { %1469 = vrcp.f32 %v893_v28 }
0x1195   :  { %v1470_v29 = vpop.eup %1469 }
0x1196   :  { %v897_v1 = vmul.f32 %v1470_v29, %v807_v62 }
0x11f9   :  { %v900_v30 = vpop.permute.xlu1 %899 }
0x11fa   :  { %v902_v31 = vmul.f32 %v1470_v29, %v900_v30 }
0x11fc   :  { %904 = vrot.lane.b32.xlu0 %v902_v31, %s1605_s12 }
0x126e   :  { %v905_v32 = vpop.permute.xlu0 %904 }
0x126f   :  { %v907_v3 = vadd.f32 %v905_v32, %v897_v1 }
0x1271   :  { %1471 = vtanh.f32 %v907_v3 }
0x127b   :  { %v1472_v33 = vpop.eup %1471 }
0x127c   :  { %910 = vrot.lane.b32.xlu1 %v1472_v33, %s1604_s11 }
0x12ee   :  { %v911_v34 = vpop.permute.xlu1 %910 }
0x12ef   :  { %v913_v35 = vmul.f32 %v1470_v29, %v911_v34 }
0x12f1   :  { %915 = vrot.lane.b32.xlu0 %v913_v35, %s1605_s12 }
0x1363   :  { %v916_v36 = vpop.permute.xlu0 %915 }
0x1364   :  { %1335 = vmatmul.mubr.msk.f32.vlgmr.msra.gmra.mrb[8].mxu1 %vm211_vm2, %v916_v36 }
0x1437   :  { %v985_v38 = vpop.f32.mrb[8].mxu1 }
0x1438   :  { %v989_v39 = vadd.f32 %v985_v38, %v202_v37  ;;  %v1336_v40 = vpop.f32.mrb[9].mxu1 }
0x143a   :  { %1473 = vtanh.f32 %v989_v39  ;;  %v1175_v42 = vmul.f32 -1.442695, %v989_v39 }
0x143c   :  { %1475 = vpow2.f32 %v1175_v42 }
0x1444   :  { %v1474_v41 = vpop.eup %1473 }
0x1445   :  { %999 = vrot.lane.b32.xlu1 %v1474_v41, %s1604_s11 }
0x1446   :  { %v1476_v43 = vpop.eup %1475 }
0x1447   :  { %v993_v44 = vadd.f32 1.0, %v1476_v43 }
0x1449   :  { %1477 = vrcp.f32 %v993_v44 }
0x1453   :  { %v1478_v45 = vpop.eup %1477 }
0x1454   :  { %v997_v48 = vmul.f32 %v1478_v45, %v907_v3 }
0x14b7   :  { %v1000_v46 = vpop.permute.xlu1 %999 }
0x14b8   :  { %v1002_v47 = vmul.f32 %v1478_v45, %v1000_v46 }
0x14ba   :  { %1004 = vrot.lane.b32.xlu0 %v1002_v47, %s1605_s12 }
0x152c   :  { %v1005_v49 = vpop.permute.xlu0 %1004 }
0x152d   :  { %v1007_v14 = vadd.f32 %v1005_v49, %v997_v48 }
0x152f   :  { %1479 = vtanh.f32 %v1007_v14 }
0x1539   :  { %v1480_v55 = vpop.eup %1479 }
0x153a   :  { %1010 = vrot.lane.b32.xlu1 %v1480_v55, %s1604_s11  ;;  %s1525_s11 = scalar_lea.vmem %s1125_s29, 128 }
0x153b   :  { %p1526_p2 = scmp.ne.s32.totalorder %s1125_s29, %s1525_s11  ;;  %p1531_p4 = scmp.lt.s32.totalorder %s1525_s11, %s1525_s11 }
0x153d   :  { %p1532_p5 = por %p1531_p4, %p1530_p3 }
0x153e   :  { %1020 = vrot.lane.b32.xlu1 %v1007_v14, %s1606_s28 }
0x153f   :  { %p1533_p6 = pnand %p1532_p5, %p1526_p2 }
0x15ac   :  { %v1011_v56 = vpop.permute.xlu1 %1010 }
0x15ad   :  { %v1013_v57 = vmul.f32 %v1478_v45, %v1011_v56 }
0x15af   :  { %1015 = vrot.lane.b32.xlu0 %v1013_v57, %s1605_s12 }
0x15b0   :  { %v1021_v58 = vpop.permute.xlu1 %1020 }
0x15b1   :  { %1023 = vst.msk [vmem:[#allocation8] sm:$0xff] %vm211_vm2, %v1021_v58 }
0x1621   :  { %v1016_v59 = vpop.permute.xlu0 %1015 }
0x1622   :  { %1018 = vst.msk [vmem:[#allocation7] sm:$0xff] %vm211_vm2, %v1016_v59  ;;  %1346 = vmatmul.mubr.msk.f32.vlgmr.msra.gmra.mrb[14].mxu0 %vm211_vm2, %v1016_v59 }
0x1623   :  { %1536 = shalt.err (!%p1533_p6)
}
0x1624   :  { %s1537_s13 = scalar_lea.hbm %s1924_s9, 128 }
0x1625   :  { %p1538_p7 = scmp.ne.s32.totalorder %s1924_s9, %s1537_s13  ;;  %p1541_p8 = scmp.lt.u32.totalorder %s1537_s13, %s1924_s9 }
0x1627   :  { %p1543_p9 = pnand %p1541_p8, %p1538_p7 }
0x1629   :  { %1546 = shalt.err (!%p1543_p9)
}
0x162a   :  { %1127 = dma.vmem_to_hbm [thread:$0]  %s1125_s29, 128, %s1924_s9, [#allocation9]  }
0x162b   :  { %s1547_s20 = scalar_lea.vmem %s1115_s30, 128  ;;  %p1552_p11 = scmp.lt.s32.totalorder %s1115_s30, %s1115_s30 }
0x162c   :  { %p1548_p10 = scmp.ne.s32.totalorder %s1115_s30, %s1547_s20  ;;  %p1553_p12 = scmp.lt.s32.totalorder %s1547_s20, %s1547_s20 }
0x162e   :  { %p1554_p13 = por %p1553_p12, %p1552_p11 }
0x1630   :  { %p1555_p0 = pnand %p1554_p13, %p1548_p10 }
0x1632   :  { %1558 = shalt.err (!%p1555_p0)
}
0x1633   :  { %s1559_s21 = scalar_lea.hbm %s1923_s8, 128 }
0x1634   :  { %p1560_p1 = scmp.ne.s32.totalorder %s1923_s8, %s1559_s21  ;;  %p1563_p2 = scmp.lt.u32.totalorder %s1559_s21, %s1923_s8 }
0x1636   :  { %p1565_p3 = pnand %p1563_p2, %p1560_p1 }
0x1638   :  { %1568 = shalt.err (!%p1565_p3)
}
0x1639   :  { %1117 = dma.vmem_to_hbm [thread:$0]  %s1115_s30, 128, %s1923_s8, [#allocation4]   ;;  %v1176_v0 = vld [vmem:[%s1922_s7] ss:$0 sm:$0xff] }
0x163a   :  { %s1609_s27 = smov [#allocation10]  }
0x163b   :  { %s1134_s28 = sshll.u32 %s1609_s27, 4  ;;  %s1135_s28 = int_to_ptr.vmem [resolvable:$true] %s1134_s28 }
0x163c   :  { %s1569_s6 = scalar_lea.vmem %s1135_s28, 128  ;;  %p1574_p5 = scmp.lt.s32.totalorder %s1135_s28, %s1135_s28 }
0x163d   :  { %p1570_p4 = scmp.ne.s32.totalorder %s1135_s28, %s1569_s6  ;;  %p1575_p6 = scmp.lt.s32.totalorder %s1569_s6, %s1569_s6 }
0x163f   :  { %p1576_p7 = por %p1575_p6, %p1574_p5 }
0x1641   :  { %p1577_p8 = pnand %p1576_p7, %p1570_p4 }
0x16f5   :  { %v1103_v60 = vpop.f32.mrb[14].mxu0 }
0x16f6   :  { %v1104_v61 = vadd.f32 %v1176_v0, %v1103_v60  ;;  %v1347_v63 = vpop.f32.mrb[15].mxu0 }
0x16f8   :  { %1107 = vst [vmem:[#allocation10] sm:$0xff] %v1104_v61 }
0x16f9   :  { %1580 = shalt.err (!%p1577_p8)
}
0x16fa   :  { %s1581_s4 = scalar_lea.hbm %s1925_s10, 128 }
0x16fb   :  { %p1582_p9 = scmp.ne.s32.totalorder %s1925_s10, %s1581_s4  ;;  %p1585_p10 = scmp.lt.u32.totalorder %s1581_s4, %s1925_s10 }
0x16fd   :  { %p1587_p11 = pnand %p1585_p10, %p1582_p9 }
0x16ff   :  { %1590 = shalt.err (!%p1587_p11)
}
0x1700   :  { %1137 = dma.vmem_to_hbm [thread:$0]  %s1135_s28, 128, %s1925_s10, [#allocation9]  }
0x1701   :  { %1595 = dma.done.wait [#allocation4], 128  }
0x1702   :  { %1596 = vsyncadd [#allocation4], 4294967168 }
0x1703   :  { %1597 = dma.done.wait [#allocation9], 256  }
0x1704   :  { %1598 = vsyncadd [#allocation9], 4294967040 }
0x1705   :  { %1147 = vsyncpa [#allocation3], 1 }
0x1706   :  { %1148 = vsyncpa [#allocation6], 1 }
0x1707   :  { %1149 = vsyncpa [#allocation4], 1 }
0x1708   :  { %1150 = vsyncpa [#allocation9], 1 }

</bundles_post_ra>
